<compile_context>
chip_gen: v6e
topology: v6e:2x2x1
jax: 0.10.0
libtpu: 0.0.40
codegen_flags: <defaults>
</compile_context>

<pallas_src>
import math

import jax
import jax.numpy as jnp
from jax.experimental import pallas as pl
from jax.experimental.pallas import tpu as pltpu

WIDTH = 1024                      # lane-dense last dim (multiple of 128)
TARGET_BLOCK_BYTES = 2 * 1024 * 1024   # ~2 MiB per buffer -> safe on v5e/v6e/v7x


def _soft_exp_pos_kernel(params_ref, x_ref, o_ref):
    """alpha > 0 :  (exp(alpha*x) - 1) * (1/alpha) + alpha."""
    a = params_ref[0]        # alpha        (SMEM scalar)
    inv_a = params_ref[1]    # 1 / alpha    (precomputed in wrapper)
    x = x_ref[...].astype(jnp.float32)
    y = (jnp.exp(a * x) - 1.0) * inv_a + a
    o_ref[...] = y.astype(o_ref.dtype)


def _soft_exp_neg_kernel(params_ref, x_ref, o_ref):
    """alpha < 0 :  -log(1 - alpha*(x + alpha)) * (1/alpha)."""
    a = params_ref[0]
    inv_a = params_ref[1]
    x = x_ref[...].astype(jnp.float32)
    y = -jnp.log(1.0 - a * (x + a)) * inv_a
    o_ref[...] = y.astype(o_ref.dtype)


def soft_exponential(x: jax.Array, alpha: float) -> jax.Array:
    """Applies soft-exponential elementwise via a Pallas TPU kernel."""
    alpha = float(alpha)
    if alpha == 0.0:
        # Identity branch -- mirrors the PyTorch forward exactly.
        return x

    orig_shape = x.shape
    dtype = x.dtype
    n = math.prod(orig_shape)
    itemsize = jnp.dtype(dtype).itemsize

    # ---- tiling: lane-dense slab (rows_padded, WIDTH), ~2 MiB blocks ----
    target_rows = max(8, TARGET_BLOCK_BYTES // (WIDTH * itemsize))
    target_rows = (target_rows // 8) * 8                 # sublane aligned
    rows = -(-n // WIDTH)                                # ceil
    rows8 = -(-rows // 8) * 8                            # multiple of 8
    block_rows = min(target_rows, rows8)
    grid_m = -(-rows8 // block_rows)
    rows_padded = grid_m * block_rows
    total_padded = rows_padded * WIDTH

    flat = x.reshape(-1)
    if total_padded != n:
        flat = jnp.pad(flat, (0, total_padded - n))
    x2 = flat.reshape(rows_padded, WIDTH)

    # Scalars in SMEM: [alpha, 1/alpha]  (reciprocal computed once, host side).
    params = jnp.asarray([alpha, 1.0 / alpha], dtype=jnp.float32)
    kernel = _soft_exp_neg_kernel if alpha < 0.0 else _soft_exp_pos_kernel

    out = pl.pallas_call(
        kernel,
        out_shape=jax.ShapeDtypeStruct((rows_padded, WIDTH), dtype),
        grid=(grid_m,),
        in_specs=[
            pl.BlockSpec(memory_space=pltpu.SMEM),                 # [alpha, 1/alpha]
            pl.BlockSpec((block_rows, WIDTH), lambda i: (i, 0)),   # x slab
        ],
        out_specs=pl.BlockSpec((block_rows, WIDTH), lambda i: (i, 0)),
        compiler_params=pltpu.CompilerParams(
            dimension_semantics=("parallel",),
        ),
    )(params, x2)

    return out.reshape(-1)[:n].reshape(orig_shape)


def _reference(x, alpha):
    """Pure-JAX reference mirroring the PyTorch forward."""
    if alpha == 0.0:
        return x
    xf = x.astype(jnp.float32)
    if alpha < 0.0:
        y = -jnp.log(1.0 - alpha * (xf + alpha)) / alpha
    else:
        y = (jnp.exp(alpha * xf) - 1.0) / alpha + alpha
    return y.astype(x.dtype)


if __name__ == "__main__":
    key = jax.random.PRNGKey(0)
    k1, k2 = jax.random.split(key)

    # ---- positive-alpha branch, f32, NCHW input (2, 4, 16, 16) ----
    ALPHA_POS = 0.5
    x = jax.random.normal(k1, (2, 4, 16, 16), dtype=jnp.float32)
    y = jax.block_until_ready(soft_exponential(x, ALPHA_POS))
    y_ref = _reference(x, ALPHA_POS)
    assert y.shape == x.shape and y.dtype == x.dtype
    assert jnp.allclose(y, y_ref, atol=1e-5, rtol=1e-5), "pos-branch mismatch"

    # ---- negative-alpha branch, bounded input keeps log argument positive ----
    ALPHA_NEG = -0.5
    xn = jax.random.uniform(k2, (2, 4, 16, 16), dtype=jnp.float32,
                            minval=-1.0, maxval=1.0)
    yn = jax.block_until_ready(soft_exponential(xn, ALPHA_NEG))
    yn_ref = _reference(xn, ALPHA_NEG)
    assert jnp.allclose(yn, yn_ref, atol=1e-5, rtol=1e-5), "neg-branch mismatch"

    # ---- alpha == 0 identity branch ----
    y0 = soft_exponential(x, 0.0)
    assert jnp.array_equal(y0, x), "identity branch mismatch"

    # ---- bf16 input: in-kernel cast path (compute f32, store bf16) ----
    xb = x.astype(jnp.bfloat16)
    yb = jax.block_until_ready(soft_exponential(xb, ALPHA_POS))
    yb_ref = _reference(xb, ALPHA_POS)
    assert yb.dtype == jnp.bfloat16
    assert jnp.allclose(yb.astype(jnp.float32), yb_ref.astype(jnp.float32),
                        atol=2e-2, rtol=2e-2), "bf16 mismatch"

    print("KERNEL_OK")
</pallas_src>

<mosaic_0001>
module attributes {stable_mosaic.version = 11 : i64} {
  func.func @_soft_exp_pos_kernel(%arg0: i32, %arg1: memref<2xf32, #tpu.memory_space<smem>>, %arg2: memref<8x1024xf32, #tpu.memory_space<vmem>>, %arg3: memref<8x1024xf32, #tpu.memory_space<vmem>>) attributes {dimension_semantics = [#tpu.dimension_semantics<parallel>], iteration_bounds = array<i64: 1>, scalar_prefetch = 0 : i64, scratch_operands = 0 : i64, tpu.core_type = #tpu.core_type<tc>, window_params = [{transform_indices = @transform_0, window_bounds = array<i64: 2>}, {transform_indices = @transform_1, window_bounds = array<i64: 8, 1024>}, {transform_indices = @transform_2, window_bounds = array<i64: 8, 1024>}]} {
    %c0 = arith.constant 0 : index
    %0 = memref.load %arg1[%c0] : memref<2xf32, #tpu.memory_space<smem>>
    %c1 = arith.constant 1 : index
    %1 = memref.load %arg1[%c1] : memref<2xf32, #tpu.memory_space<smem>>
    %c0_0 = arith.constant 0 : index
    %c0_1 = arith.constant 0 : index
    %2 = vector.load %arg2[%c0_0, %c0_1] : memref<8x1024xf32, #tpu.memory_space<vmem>>, vector<8x1024xf32>
    %3 = vector.broadcast %0 : f32 to vector<8x1024xf32>
    %4 = arith.mulf %3, %2 : vector<8x1024xf32>
    %5 = math.exp %4 : vector<8x1024xf32>
    %cst = arith.constant 1.000000e+00 : f32
    %6 = vector.broadcast %cst : f32 to vector<8x1024xf32>
    %7 = arith.subf %5, %6 : vector<8x1024xf32>
    %8 = vector.broadcast %1 : f32 to vector<8x1024xf32>
    %9 = arith.mulf %7, %8 : vector<8x1024xf32>
    %10 = vector.broadcast %0 : f32 to vector<8x1024xf32>
    %11 = arith.addf %9, %10 : vector<8x1024xf32>
    %c0_2 = arith.constant 0 : index
    %c0_3 = arith.constant 0 : index
    %12 = vector.load %arg3[%c0_2, %c0_3] : memref<8x1024xf32, #tpu.memory_space<vmem>>, vector<8x1024xf32>
    tpu.vector_store %arg3[%c0_2, %c0_3], %11 {strides = array<i32>} : memref<8x1024xf32, #tpu.memory_space<vmem>>, vector<8x1024xf32>,
    return
  }
  func.func @transform_0(%arg0: i32) -> i32 {
    %c0_i32 = arith.constant 0 : i32
    %c0_i32_0 = arith.constant 0 : i32
    return %c0_i32 : i32
  }
  func.func @transform_1(%arg0: i32) -> (i32, i32) {
    %c0_i32 = arith.constant 0 : i32
    %c0_i32_0 = arith.constant 0 : i32
    return %arg0, %c0_i32 : i32, i32
  }
  func.func @transform_2(%arg0: i32) -> (i32, i32) {
    %c0_i32 = arith.constant 0 : i32
    %c0_i32_0 = arith.constant 0 : i32
    return %arg0, %c0_i32 : i32, i32
  }
}

</mosaic_0001>

<bundles_post_ra>
// kernel: tpu_custom_call.1
= control target key start
LH: loop header
LB: loop body
LE: loop exit
PB: predicated region body
PF: predicated region fallthrough
CT: control target
= control target key end

     0   :  { %7 = vsyncpa [#allocation5], 0  ;;  %s246_s0 = inlined_call_operand.hbm [shape: f32[2], index: 0, kind: input, shape index: {}]   ;;  %s247_s1 = inlined_call_operand.hbm [shape: f32[8,1024], index: 1, kind: input, shape index: {}]   ;;  %s248_s2 = inlined_call_operand.hbm [shape: f32[8,1024], index: 2, kind: output, shape index: {}]  }
   0x1   :  { %8 = vsyncpa [#allocation3], 0 }
   0x2   :  { %9 = vsyncpa [#allocation4], 0  ;;  %s201_s9 = smov [#allocation2]   ;;  %s202_s12 = smov [#allocation6]  }
   0x3   :  { %17 = dma.hbm_to_smem %s246_s0, 16, %s201_s9, [#allocation5]  }
   0x4   :  { %s24_s13 = sshll.u32 %s202_s12, 4  ;;  %s25_s13 = int_to_ptr.vmem [resolvable:$true] %s24_s13 }
   0x5   :  { %s163_s14 = scalar_lea.vmem %s25_s13, 1024  ;;  %p168_p1 = scmp.lt.s32.totalorder %s25_s13, %s25_s13 }
   0x6   :  { %p164_p0 = scmp.ne.s32.totalorder %s25_s13, %s163_s14  ;;  %p169_p2 = scmp.lt.s32.totalorder %s163_s14, %s163_s14 }
   0x8   :  { %p170_p3 = por %p169_p2, %p168_p1 }
   0xa   :  { %p171_p4 = pnand %p170_p3, %p164_p0 }
   0xc   :  { %174 = shalt.err (!%p171_p4)
}
   0xd   :  { %27 = dma.hbm_to_vmem [thread:$0]  %s247_s1, 1024, %s25_s13, [#allocation3]  }
   0xe   :  { %195 = dma.done.wait [#allocation5], 16  }
   0xf   :  { %196 = vsyncadd [#allocation5], 4294967280 }
  0x10   :  { %197 = dma.done.wait [#allocation3], 1024  }
  0x11   :  { %198 = vsyncadd [#allocation3], 4294966272 }
  0x12   :  { %34 = sfence }
  0x13   :  { %s35_s0 = sld [smem:[#allocation2]]  ;;  %v37_v0 = vld [vmem:[#allocation6] sm:$0xff]  ;;  %v38_v1 = vld [vmem:[#allocation6 + $0x8] sm:$0xff]  ;;  %v39_v2 = vld [vmem:[#allocation6 + $0x10] sm:$0xff]  ;;  %s203_s17 = smov [#allocation7]  }
  0x14   :  { %v40_v3 = vld [vmem:[#allocation6 + $0x18] sm:$0xff]  ;;  %v41_v4 = vld [vmem:[#allocation6 + $0x20] sm:$0xff]  ;;  %v42_v5 = vld [vmem:[#allocation6 + $0x28] sm:$0xff]  ;;  %s119_s1 = sld [smem:[#allocation2 + $0x1]]  ;;  %s109_s18 = sshll.u32 %s203_s17, 4  ;;  %s110_s18 = int_to_ptr.vmem [resolvable:$true] %s109_s18 }
  0x15   :  { %v43_v7 = vld [vmem:[#allocation6 + $0x30] sm:$0xff]  ;;  %v44_v11 = vld [vmem:[#allocation6 + $0x38] sm:$0xff]  ;;  %s175_s19 = scalar_lea.vmem %s110_s18, 1024  ;;  %p180_p6 = scmp.lt.s32.totalorder %s110_s18, %s110_s18 }
  0x16   :  { %p176_p5 = scmp.ne.s32.totalorder %s110_s18, %s175_s19  ;;  %p181_p7 = scmp.lt.s32.totalorder %s175_s19, %s175_s19 }
  0x18   :  { %p182_p8 = por %p181_p7, %p180_p6 }
  0x19   :  { %v225_v6 = vstv %s35_s0 }
  0x1a   :  { %v46_v8 = vmul.f32 %v225_v6, %v37_v0  ;;  %v47_v9 = vmul.f32 %v225_v6, %v38_v1  ;;  %v48_v10 = vmul.f32 %v225_v6, %v39_v2  ;;  %v49_v12 = vmul.f32 %v225_v6, %v40_v3  ;;  %p183_p9 = pnand %p182_p8, %p176_p5 }
  0x1b   :  { %v50_v13 = vmul.f32 %v225_v6, %v41_v4  ;;  %v51_v14 = vmul.f32 %v225_v6, %v42_v5  ;;  %v52_v18 = vmul.f32 %v225_v6, %v43_v7  ;;  %v53_v20 = vmul.f32 %v225_v6, %v44_v11 }
  0x1c   :  { %v54_v15 = vmul.f32 1.442695, %v46_v8  ;;  %v56_v16 = vmul.f32 1.442695, %v47_v9  ;;  %v58_v17 = vmul.f32 1.442695, %v48_v10  ;;  %v78_v26 = vstv %s119_s1 }
  0x1d   :  { %v60_v19 = vmul.f32 1.442695, %v49_v12  ;;  %v62_v21 = vmul.f32 1.442695, %v50_v13  ;;  %v64_v22 = vmul.f32 1.442695, %v51_v14 }
  0x1e   :  { %131 = vpow2.f32 %v54_v15  ;;  %v66_v23 = vmul.f32 1.442695, %v52_v18  ;;  %v68_v24 = vmul.f32 1.442695, %v53_v20 }
  0x1f   :  { %133 = vpow2.f32 %v56_v16 }
  0x20   :  { %135 = vpow2.f32 %v58_v17 }
  0x21   :  { %137 = vpow2.f32 %v60_v19 }
  0x22   :  { %139 = vpow2.f32 %v62_v21 }
  0x23   :  { %141 = vpow2.f32 %v64_v22 }
  0x24   :  { %143 = vpow2.f32 %v66_v23 }
  0x25   :  { %145 = vpow2.f32 %v68_v24 }
  0x2b   :  { %v132_v25 = vpop.eup %131 }
  0x2c   :  { %v134_v27 = vpop.eup %133  ;;  %v120_v28 = vadd.f32 -1.0, %v132_v25 }
  0x2d   :  { %v136_v29 = vpop.eup %135  ;;  %v121_v30 = vadd.f32 -1.0, %v134_v27 }
  0x2e   :  { %v138_v31 = vpop.eup %137  ;;  %v79_v32 = vmul.f32 %v120_v28, %v78_v26  ;;  %v122_v33 = vadd.f32 -1.0, %v136_v29 }
  0x2f   :  { %v140_v34 = vpop.eup %139  ;;  %v80_v35 = vmul.f32 %v121_v30, %v78_v26  ;;  %v123_v36 = vadd.f32 -1.0, %v138_v31 }
  0x30   :  { %v142_v37 = vpop.eup %141  ;;  %v87_v38 = vadd.f32 %v79_v32, %v225_v6  ;;  %v81_v39 = vmul.f32 %v122_v33, %v78_v26  ;;  %v124_v40 = vadd.f32 -1.0, %v140_v34 }
  0x31   :  { %v144_v41 = vpop.eup %143  ;;  %v88_v42 = vadd.f32 %v80_v35, %v225_v6  ;;  %v82_v43 = vmul.f32 %v123_v36, %v78_v26  ;;  %v125_v44 = vadd.f32 -1.0, %v142_v37 }
  0x32   :  { %v146_v45 = vpop.eup %145  ;;  %95 = vst [vmem:[#allocation7] sm:$0xff] %v87_v38  ;;  %v89_v46 = vadd.f32 %v81_v39, %v225_v6  ;;  %v83_v47 = vmul.f32 %v124_v40, %v78_v26  ;;  %v126_v48 = vadd.f32 -1.0, %v144_v41 }
  0x33   :  { %96 = vst [vmem:[#allocation7 + $0x8] sm:$0xff] %v88_v42  ;;  %v90_v49 = vadd.f32 %v82_v43, %v225_v6  ;;  %v84_v50 = vmul.f32 %v125_v44, %v78_v26  ;;  %v127_v51 = vadd.f32 -1.0, %v146_v45 }
  0x34   :  { %97 = vst [vmem:[#allocation7 + $0x10] sm:$0xff] %v89_v46  ;;  %v91_v52 = vadd.f32 %v83_v47, %v225_v6  ;;  %v85_v53 = vmul.f32 %v126_v48, %v78_v26 }
  0x35   :  { %98 = vst [vmem:[#allocation7 + $0x18] sm:$0xff] %v90_v49  ;;  %v92_v54 = vadd.f32 %v84_v50, %v225_v6  ;;  %v86_v55 = vmul.f32 %v127_v51, %v78_v26 }
  0x36   :  { %99 = vst [vmem:[#allocation7 + $0x20] sm:$0xff] %v91_v52  ;;  %v93_v56 = vadd.f32 %v85_v53, %v225_v6 }
  0x37   :  { %100 = vst [vmem:[#allocation7 + $0x28] sm:$0xff] %v92_v54  ;;  %v94_v57 = vadd.f32 %v86_v55, %v225_v6 }
  0x38   :  { %101 = vst [vmem:[#allocation7 + $0x30] sm:$0xff] %v93_v56 }
  0x39   :  { %102 = vst [vmem:[#allocation7 + $0x38] sm:$0xff] %v94_v57 }
  0x3a   :  { %186 = shalt.err (!%p183_p9)
}
  0x3b   :  { %112 = dma.vmem_to_hbm [thread:$0]  %s110_s18, 1024, %s248_s2, [#allocation4]  }
  0x3c   :  { %199 = dma.done.wait [#allocation4], 1024  }
  0x3d   :  { %200 = vsyncadd [#allocation4], 4294966272 }
  0x3e   :  { %116 = vsyncpa [#allocation3], 1 }
  0x3f   :  { %117 = vsyncpa [#allocation4], 1 }
  0x40   :  { %118 = vsyncpa [#allocation5], 1 }

</bundles_post_ra>
